<compile_context>
chip_gen: v7x
topology: tpu7x:2x2x1
jax: 0.10.0
libtpu: 0.0.40
codegen_flags: <defaults>
</compile_context>

<pallas_src>
import math
import functools

import jax
import jax.numpy as jnp
from jax.experimental import pallas as pl
from jax.experimental.pallas import tpu as pltpu


def _round_up(v, m):
    return (v + m - 1) // m * m


# ----------------------------------------------------------------------------
# Fused OPN forward kernel (single invocation, everything VMEM-resident).
# ----------------------------------------------------------------------------
def _opn_fused_kernel(x_ref, wb_ref, bb_ref, w7lo_ref, w7hi_ref, b7_ref,
                      w8_ref, b8_ref, o_ref, *, tuple_len, batch_pad):
    T = tuple_len
    tb = batch_pad

    # --- base network: one batched matmul over all T*tb frame rows ----------
    # x_ref is already bf16 (cast in the wrapper); accumulate in f32.
    feat = jnp.dot(x_ref[...], wb_ref[...], preferred_element_type=jnp.float32)
    feat = jnp.maximum(feat + bb_ref[...], 0.0)            # (T*tb, F_pad) f32
    feat_bf = feat.astype(jnp.bfloat16)                    # cast ONCE for MXU

    # --- fc7 batched across all pairs (split weights, no concat) ------------
    # FI rows = first frame of each pair, FJ rows = second frame of each pair.
    # Each slice is 8-row aligned (tb is a multiple of 8); axis-0 concat is
    # sublane-aligned vreg copies.
    fi_rows, fj_rows = [], []
    for i in range(T):
        for j in range(i + 1, T):
            fi_rows.append(feat_bf[i * tb:(i + 1) * tb, :])
            fj_rows.append(feat_bf[j * tb:(j + 1) * tb, :])
    pair_num = len(fi_rows)
    fi = jnp.concatenate(fi_rows, axis=0)                  # (pair_num*tb, F_pad)
    fj = jnp.concatenate(fj_rows, axis=0)                  # (pair_num*tb, F_pad)

    # fc7(cat(fi, fj)) = fi @ w7_lo + fj @ w7_hi + b7  -> just 2 matmuls total.
    acc = jnp.dot(fi, w7lo_ref[...], preferred_element_type=jnp.float32)
    acc = acc + jnp.dot(fj, w7hi_ref[...], preferred_element_type=jnp.float32)
    pair = jnp.maximum(acc + b7_ref[...], 0.0).astype(jnp.bfloat16)
    # pair: (pair_num*tb, 512); row p*tb + b holds pair p, batch-row b.

    # --- fc8: one matmul with K = 512*pair_num -------------------------------
    # Lane-axis concat of 512-wide (lane-tile aligned) chunks -> (tb, 512*P).
    h = jnp.concatenate(
        [pair[p * tb:(p + 1) * tb, :] for p in range(pair_num)], axis=1)
    logits = jnp.dot(h, w8_ref[...], preferred_element_type=jnp.float32)

    # dropout on h is eval-mode identity; bias added once at the end.
    o_ref[...] = (logits + b8_ref[...]).astype(o_ref.dtype)  # lane-dense store


# ----------------------------------------------------------------------------
# One-time parameter preparation (cast / pad / split) — call ONCE at init.
# ----------------------------------------------------------------------------
def prepare_opn_params(params, *, feature_size, tuple_len):
    F = feature_size
    F_pad = max(128, _round_up(F, 128))
    class_num = math.factorial(tuple_len)
    N_pad = max(128, _round_up(class_num, 128))

    wb = jnp.pad(params["w_base"],
                 ((0, 0), (0, F_pad - F))).astype(jnp.bfloat16)
    bb = jnp.pad(params["b_base"],
                 (0, F_pad - F)).reshape(1, F_pad).astype(jnp.float32)
    # fc7 split weights; zero-pad the K dim to F_pad (padded feat cols are 0
    # anyway, and the padded weight rows are 0, so results are exact).
    w7lo = jnp.pad(params["w7"][:F, :],
                   ((0, F_pad - F), (0, 0))).astype(jnp.bfloat16)
    w7hi = jnp.pad(params["w7"][F:, :],
                   ((0, F_pad - F), (0, 0))).astype(jnp.bfloat16)
    b7 = params["b7"].reshape(1, 512).astype(jnp.float32)
    w8 = jnp.pad(params["w8"],
                 ((0, 0), (0, N_pad - class_num))).astype(jnp.bfloat16)
    b8 = jnp.pad(params["b8"],
                 (0, N_pad - class_num)).reshape(1, N_pad).astype(jnp.float32)

    prep = {"wb": wb, "bb": bb, "w7lo": w7lo, "w7hi": w7hi,
            "b7": b7, "w8": w8, "b8": b8}
    # Materialize once so the casts/pads never re-run under the jitted forward.
    return jax.tree_util.tree_map(lambda a: jax.device_put(a), prep)


# ----------------------------------------------------------------------------
# Wrapper: layout plumbing + single pallas_call.
# ----------------------------------------------------------------------------
def opn_forward(x, prep, *, tuple_len):
    """x: (B, T, C, H, W) float32, prep from prepare_opn_params
    -> logits (B, tuple_len!)"""
    B, T = x.shape[0], x.shape[1]
    assert T == tuple_len
    in_dim = x.shape[2] * x.shape[3] * x.shape[4]
    class_num = math.factorial(T)
    pair_num = T * (T - 1) // 2

    F_pad = prep["wb"].shape[1]
    N_pad = prep["w8"].shape[1]
    B_pad = max(8, _round_up(B, 8))                 # sublane-aligned batch

    # Frame-major, batch-padded, bf16 activation matrix: rows
    # [i*B_pad, (i+1)*B_pad) hold frame i, so in-kernel frame slices are
    # 8-row aligned.  bf16 here halves the dominant HBM->VMEM DMA.
    xf = jnp.transpose(x.reshape(B, T, in_dim), (1, 0, 2))     # (T, B, in_dim)
    xf = jnp.pad(xf, ((0, 0), (0, B_pad - B), (0, 0)))
    xf = xf.reshape(T * B_pad, in_dim).astype(jnp.bfloat16)

    kernel = functools.partial(_opn_fused_kernel, tuple_len=T,
                               batch_pad=B_pad)
    out = pl.pallas_call(
        kernel,
        out_shape=jax.ShapeDtypeStruct((B_pad, N_pad), jnp.float32),
        in_specs=[
            pl.BlockSpec((T * B_pad, in_dim), lambda: (0, 0)),
            pl.BlockSpec((in_dim, F_pad), lambda: (0, 0)),
            pl.BlockSpec((1, F_pad), lambda: (0, 0)),
            pl.BlockSpec((F_pad, 512), lambda: (0, 0)),
            pl.BlockSpec((F_pad, 512), lambda: (0, 0)),
            pl.BlockSpec((1, 512), lambda: (0, 0)),
            pl.BlockSpec((512 * pair_num, N_pad), lambda: (0, 0)),
            pl.BlockSpec((1, N_pad), lambda: (0, 0)),
        ],
        out_specs=pl.BlockSpec((B_pad, N_pad), lambda: (0, 0)),
    )(xf, prep["wb"], prep["bb"], prep["w7lo"], prep["w7hi"],
      prep["b7"], prep["w8"], prep["b8"])

    return out[:B, :class_num]


# ----------------------------------------------------------------------------
# Parameter construction (deterministic, in-script).
# ----------------------------------------------------------------------------
def init_opn_params(key, *, in_dim, feature_size, tuple_len):
    class_num = math.factorial(tuple_len)
    pair_num = tuple_len * (tuple_len - 1) // 2
    k = jax.random.split(key, 6)

    def unif(k_, shape, fan_in):
        bound = 1.0 / math.sqrt(fan_in)
        return jax.random.uniform(k_, shape, jnp.float32, -bound, bound)

    return {
        # synthetic base_network: Linear(in_dim -> feature_size) + ReLU
        "w_base": unif(k[0], (in_dim, feature_size), in_dim),
        "b_base": unif(k[1], (feature_size,), in_dim),
        # fc7: Linear(feature_size*2 -> 512)
        "w7": unif(k[2], (feature_size * 2, 512), feature_size * 2),
        "b7": unif(k[3], (512,), feature_size * 2),
        # fc8: Linear(512*pair_num -> class_num)
        "w8": unif(k[4], (512 * pair_num, class_num), 512 * pair_num),
        "b8": unif(k[5], (class_num,), 512 * pair_num),
    }


# ----------------------------------------------------------------------------
# Pure-JAX f32 reference (mirrors the PyTorch forward, eval-mode dropout).
# ----------------------------------------------------------------------------
def opn_reference(x, params, *, tuple_len):
    B = x.shape[0]
    f = []
    for i in range(tuple_len):
        flat = x[:, i].reshape(B, -1)
        f.append(jnp.maximum(flat @ params["w_base"] + params["b_base"], 0.0))
    pf = []
    for i in range(tuple_len):
        for j in range(i + 1, tuple_len):
            cat = jnp.concatenate([f[i], f[j]], axis=1)
            pf.append(jnp.maximum(cat @ params["w7"] + params["b7"], 0.0))
    h = jnp.concatenate(pf, axis=1)
    return h @ params["w8"] + params["b8"]


if __name__ == "__main__":
    # Small, module-consistent shapes.
    B, T, C, H, W = 2, 3, 4, 16, 16
    feature_size = 64
    in_dim = C * H * W

    key = jax.random.PRNGKey(0)
    k_x, k_p = jax.random.split(key)
    x = jax.random.normal(k_x, (B, T, C, H, W), jnp.float32)
    params = init_opn_params(k_p, in_dim=in_dim, feature_size=feature_size,
                             tuple_len=T)

    # One-time weight prep (cast/pad/split) — outside the jitted forward.
    prep = prepare_opn_params(params, feature_size=feature_size, tuple_len=T)

    fwd = jax.jit(functools.partial(opn_forward, tuple_len=T))
    out = fwd(x, prep)
    jax.block_until_ready(out)

    class_num = math.factorial(T)
    assert out.shape == (B, class_num), out.shape
    assert jnp.all(jnp.isfinite(out))

    # Tolerance check vs f32 reference (kernel uses bf16 MXU operands).
    ref = opn_reference(x, params, tuple_len=T)
    err = float(jnp.max(jnp.abs(out - ref)))
    scale = float(jnp.max(jnp.abs(ref)))
    assert err <= 5e-2 * max(1.0, scale), (err, scale)

    print("KERNEL_OK")
</pallas_src>

<mosaic_0001>
module attributes {stable_mosaic.version = 11 : i64} {
  func.func @_opn_fused_kernel(%arg0: memref<24x1024xbf16, #tpu.memory_space<vmem>>, %arg1: memref<1024x128xbf16, #tpu.memory_space<vmem>>, %arg2: memref<1x128xf32, #tpu.memory_space<vmem>>, %arg3: memref<128x512xbf16, #tpu.memory_space<vmem>>, %arg4: memref<128x512xbf16, #tpu.memory_space<vmem>>, %arg5: memref<1x512xf32, #tpu.memory_space<vmem>>, %arg6: memref<1536x128xbf16, #tpu.memory_space<vmem>>, %arg7: memref<1x128xf32, #tpu.memory_space<vmem>>, %arg8: memref<8x128xf32, #tpu.memory_space<vmem>>) attributes {dimension_semantics = [], scalar_prefetch = 0 : i64, scratch_operands = 0 : i64, tpu.core_type = #tpu.core_type<tc>} {
    %c0 = arith.constant 0 : index
    %c0_0 = arith.constant 0 : index
    %0 = vector.load %arg0[%c0, %c0_0] : memref<24x1024xbf16, #tpu.memory_space<vmem>>, vector<24x1024xbf16>
    %c0_1 = arith.constant 0 : index
    %c0_2 = arith.constant 0 : index
    %1 = vector.load %arg1[%c0_1, %c0_2] : memref<1024x128xbf16, #tpu.memory_space<vmem>>, vector<1024x128xbf16>
    %cst = arith.constant dense<0.000000e+00> : vector<24x128xf32>
    %2 = tpu.matmul %0, %1, %cst {dimension_numbers = #tpu.dot_dimension_numbers<[1], [0], [0], [1], [0, 0, 1, 1], [], []>} : vector<24x1024xbf16>, vector<1024x128xbf16>, vector<24x128xf32> -> vector<24x128xf32>
    %c0_3 = arith.constant 0 : index
    %c0_4 = arith.constant 0 : index
    %3 = vector.load %arg2[%c0_3, %c0_4] : memref<1x128xf32, #tpu.memory_space<vmem>>, vector<1x128xf32>
    %4 = vector.broadcast %3 : vector<1x128xf32> to vector<24x128xf32>
    %5 = arith.addf %2, %4 : vector<24x128xf32>
    %cst_5 = arith.constant 0.000000e+00 : f32
    %6 = vector.broadcast %cst_5 : f32 to vector<24x128xf32>
    %7 = arith.maximumf %5, %6 : vector<24x128xf32>
    %8 = arith.truncf %7 : vector<24x128xf32> to vector<24x128xbf16>
    %9 = vector.extract_strided_slice %8 {offsets = [0, 0], sizes = [8, 128], strides = [1, 1]} : vector<24x128xbf16> to vector<8x128xbf16>
    %10 = vector.extract_strided_slice %8 {offsets = [8, 0], sizes = [8, 128], strides = [1, 1]} : vector<24x128xbf16> to vector<8x128xbf16>
    %11 = vector.extract_strided_slice %8 {offsets = [0, 0], sizes = [8, 128], strides = [1, 1]} : vector<24x128xbf16> to vector<8x128xbf16>
    %12 = vector.extract_strided_slice %8 {offsets = [16, 0], sizes = [8, 128], strides = [1, 1]} : vector<24x128xbf16> to vector<8x128xbf16>
    %13 = vector.extract_strided_slice %8 {offsets = [8, 0], sizes = [8, 128], strides = [1, 1]} : vector<24x128xbf16> to vector<8x128xbf16>
    %14 = vector.extract_strided_slice %8 {offsets = [16, 0], sizes = [8, 128], strides = [1, 1]} : vector<24x128xbf16> to vector<8x128xbf16>
    %15 = tpu.concatenate %9, %11, %13 in 0 : vector<8x128xbf16>, vector<8x128xbf16>, vector<8x128xbf16> -> vector<24x128xbf16>
    %16 = tpu.concatenate %10, %12, %14 in 0 : vector<8x128xbf16>, vector<8x128xbf16>, vector<8x128xbf16> -> vector<24x128xbf16>
    %c0_6 = arith.constant 0 : index
    %c0_7 = arith.constant 0 : index
    %17 = vector.load %arg3[%c0_6, %c0_7] : memref<128x512xbf16, #tpu.memory_space<vmem>>, vector<128x512xbf16>
    %cst_8 = arith.constant dense<0.000000e+00> : vector<24x512xf32>
    %18 = tpu.matmul %15, %17, %cst_8 {dimension_numbers = #tpu.dot_dimension_numbers<[1], [0], [0], [1], [0, 0, 1, 1], [], []>} : vector<24x128xbf16>, vector<128x512xbf16>, vector<24x512xf32> -> vector<24x512xf32>
    %c0_9 = arith.constant 0 : index
    %c0_10 = arith.constant 0 : index
    %19 = vector.load %arg4[%c0_9, %c0_10] : memref<128x512xbf16, #tpu.memory_space<vmem>>, vector<128x512xbf16>
    %cst_11 = arith.constant dense<0.000000e+00> : vector<24x512xf32>
    %20 = tpu.matmul %16, %19, %cst_11 {dimension_numbers = #tpu.dot_dimension_numbers<[1], [0], [0], [1], [0, 0, 1, 1], [], []>} : vector<24x128xbf16>, vector<128x512xbf16>, vector<24x512xf32> -> vector<24x512xf32>
    %21 = arith.addf %18, %20 : vector<24x512xf32>
    %c0_12 = arith.constant 0 : index
    %c0_13 = arith.constant 0 : index
    %22 = vector.load %arg5[%c0_12, %c0_13] : memref<1x512xf32, #tpu.memory_space<vmem>>, vector<1x512xf32>
    %23 = vector.broadcast %22 : vector<1x512xf32> to vector<24x512xf32>
    %24 = arith.addf %21, %23 : vector<24x512xf32>
    %cst_14 = arith.constant 0.000000e+00 : f32
    %25 = vector.broadcast %cst_14 : f32 to vector<24x512xf32>
    %26 = arith.maximumf %24, %25 : vector<24x512xf32>
    %27 = arith.truncf %26 : vector<24x512xf32> to vector<24x512xbf16>
    %28 = vector.extract_strided_slice %27 {offsets = [0, 0], sizes = [8, 512], strides = [1, 1]} : vector<24x512xbf16> to vector<8x512xbf16>
    %29 = vector.extract_strided_slice %27 {offsets = [8, 0], sizes = [8, 512], strides = [1, 1]} : vector<24x512xbf16> to vector<8x512xbf16>
    %30 = vector.extract_strided_slice %27 {offsets = [16, 0], sizes = [8, 512], strides = [1, 1]} : vector<24x512xbf16> to vector<8x512xbf16>
    %31 = tpu.concatenate %28, %29, %30 in 1 : vector<8x512xbf16>, vector<8x512xbf16>, vector<8x512xbf16> -> vector<8x1536xbf16>
    %c0_15 = arith.constant 0 : index
    %c0_16 = arith.constant 0 : index
    %32 = vector.load %arg6[%c0_15, %c0_16] : memref<1536x128xbf16, #tpu.memory_space<vmem>>, vector<1536x128xbf16>
    %cst_17 = arith.constant dense<0.000000e+00> : vector<8x128xf32>
    %33 = tpu.matmul %31, %32, %cst_17 {dimension_numbers = #tpu.dot_dimension_numbers<[1], [0], [0], [1], [0, 0, 1, 1], [], []>} : vector<8x1536xbf16>, vector<1536x128xbf16>, vector<8x128xf32> -> vector<8x128xf32>
    %c0_18 = arith.constant 0 : index
    %c0_19 = arith.constant 0 : index
    %34 = vector.load %arg7[%c0_18, %c0_19] : memref<1x128xf32, #tpu.memory_space<vmem>>, vector<1x128xf32>
    %35 = vector.broadcast %34 : vector<1x128xf32> to vector<8x128xf32>
    %36 = arith.addf %33, %35 : vector<8x128xf32>
    %c0_20 = arith.constant 0 : index
    %c0_21 = arith.constant 0 : index
    %37 = vector.load %arg8[%c0_20, %c0_21] : memref<8x128xf32, #tpu.memory_space<vmem>>, vector<8x128xf32>
    tpu.vector_store %arg8[%c0_20, %c0_21], %36 {strides = array<i32>} : memref<8x128xf32, #tpu.memory_space<vmem>>, vector<8x128xf32>,
    return
  }
}

</mosaic_0001>

<bundles_post_ra>
// kernel: opn_forward.1
= control target key start
LH: loop header
LB: loop body
LE: loop exit
PB: predicated region body
PF: predicated region fallthrough
CT: control target
= control target key end

     0   :  { %13 = vsyncpa [#allocation3], 0  ;;  %s3873_s0 = inlined_call_operand.vmem [shape: bf16[24,1024], index: 0, kind: input, shape index: {}]   ;;  %s3874_s1 = inlined_call_operand.hbm [shape: bf16[1024,128], index: 1, kind: input, shape index: {}]   ;;  %s3875_s2 = inlined_call_operand.vmem [shape: f32[1,128], index: 2, kind: input, shape index: {}]   ;;  %s3876_s3 = inlined_call_operand.hbm [shape: bf16[128,512], index: 3, kind: input, shape index: {}]   ;;  %s3877_s4 = inlined_call_operand.hbm [shape: bf16[128,512], index: 4, kind: input, shape index: {}]   ;;  %s3878_s5 = inlined_call_operand.vmem [shape: f32[1,512], index: 5, kind: input, shape index: {}]   ;;  %s3879_s6 = inlined_call_operand.vmem [shape: bf16[1536,128], index: 6, kind: input, shape index: {}]   ;;  %s3880_s7 = inlined_call_operand.vmem [shape: f32[1,128], index: 7, kind: input, shape index: {}]   ;;  %s3881_s8 = inlined_call_operand.vmem [shape: f32[8,128], index: 8, kind: output, shape index: {}]  }
   0x1   :  { %14 = vsyncpa [#allocation5], 0  ;;  %s3392_s27 = smov [#allocation4]   ;;  %s3322_s9 = scalar_lea.hbm %s3876_s3, 4096 }
   0x2   :  { %s36_s28 = sshll.u32 %s3392_s27, 4  ;;  %p3323_p0 = scmp.ne.s32.totalorder %s3876_s3, %s3322_s9  ;;  %s37_s28 = int_to_ptr.vmem [resolvable:$true] %s36_s28 }
   0x3   :  { %p3326_p1 = scmp.lt.u32.totalorder %s3322_s9, %s3876_s3 }
   0x5   :  { %p3328_p2 = pnand %p3326_p1, %p3323_p0 }
   0x7   :  { %3331 = shalt.err (!%p3328_p2)
}
   0x8   :  { %s3332_s14 = scalar_lea.vmem %s37_s28, 4096  ;;  %p3337_p4 = scmp.lt.s32.totalorder %s37_s28, %s37_s28 }
   0x9   :  { %p3333_p3 = scmp.ne.s32.totalorder %s37_s28, %s3332_s14  ;;  %p3338_p5 = scmp.lt.s32.totalorder %s3332_s14, %s3332_s14 }
   0xb   :  { %p3339_p6 = por %p3338_p5, %p3337_p4 }
   0xd   :  { %p3340_p7 = pnand %p3339_p6, %p3333_p3 }
   0xf   :  { %3343 = shalt.err (!%p3340_p7)
}
  0x10   :  { %s3393_s15 = smov 256   ;;  %s3394_s16 = smov 16  }
  0x11   :  { %42 = dma.hbm_to_vmem [thread:$0]  %s3876_s3, 4096, %s37_s28, [#allocation5], %s3393_s15, %s3393_s15, %s3394_s16  }
  0x12   :  { %s3395_s19 = smov [#allocation2]   ;;  %s3344_s23 = scalar_lea.hbm %s3874_s1, 8192 }
  0x13   :  { %s22_s20 = sshll.u32 %s3395_s19, 4  ;;  %p3345_p8 = scmp.ne.s32.totalorder %s3874_s1, %s3344_s23  ;;  %s23_s20 = int_to_ptr.vmem [resolvable:$true] %s22_s20 }
  0x14   :  { %p3348_p9 = scmp.lt.u32.totalorder %s3344_s23, %s3874_s1 }
  0x16   :  { %p3350_p10 = pnand %p3348_p9, %p3345_p8 }
  0x18   :  { %3353 = shalt.err (!%p3350_p10)
}
  0x19   :  { %s3354_s29 = scalar_lea.vmem %s23_s20, 8192  ;;  %p3359_p12 = scmp.lt.s32.totalorder %s23_s20, %s23_s20 }
  0x1a   :  { %p3355_p11 = scmp.ne.s32.totalorder %s23_s20, %s3354_s29  ;;  %p3360_p13 = scmp.lt.s32.totalorder %s3354_s29, %s3354_s29 }
  0x1c   :  { %p3361_p0 = por %p3360_p13, %p3359_p12 }
  0x1e   :  { %p3362_p1 = pnand %p3361_p0, %p3355_p11 }
  0x20   :  { %3365 = shalt.err (!%p3362_p1)
}
  0x21   :  { %s3396_s3 = smov 64   ;;  %s3397_s28 = smov 4  }
  0x22   :  { %28 = dma.hbm_to_vmem [thread:$0]  %s3874_s1, 8192, %s23_s20, [#allocation3], %s3396_s3, %s3396_s3, %s3397_s28  }
  0x23   :  { %s3398_s10 = smov [#allocation6]   ;;  %s3366_s14 = scalar_lea.hbm %s3877_s4, 4096 }
  0x24   :  { %s48_s11 = sshll.u32 %s3398_s10, 4  ;;  %p3367_p2 = scmp.ne.s32.totalorder %s3877_s4, %s3366_s14  ;;  %s49_s11 = int_to_ptr.vmem [resolvable:$true] %s48_s11 }
  0x25   :  { %p3370_p3 = scmp.lt.u32.totalorder %s3366_s14, %s3877_s4 }
  0x27   :  { %p3372_p4 = pnand %p3370_p3, %p3367_p2 }
  0x29   :  { %3375 = shalt.err (!%p3372_p4)
}
  0x2a   :  { %s3376_s22 = scalar_lea.vmem %s49_s11, 4096  ;;  %p3381_p6 = scmp.lt.s32.totalorder %s49_s11, %s49_s11 }
  0x2b   :  { %p3377_p5 = scmp.ne.s32.totalorder %s49_s11, %s3376_s22  ;;  %p3382_p7 = scmp.lt.s32.totalorder %s3376_s22, %s3376_s22 }
  0x2d   :  { %p3383_p8 = por %p3382_p7, %p3381_p6 }
  0x2f   :  { %p3384_p9 = pnand %p3383_p8, %p3377_p5 }
  0x31   :  { %3387 = shalt.err (!%p3384_p9)
}
  0x32   :  { %54 = dma.hbm_to_vmem [thread:$0]  %s3877_s4, 4096, %s49_s11, [#allocation5], %s3393_s15, %s3393_s15, %s3394_s16  }
  0x33   :  { %3388 = dma.done.wait [#allocation3], 8192  }
  0x34   :  { %3389 = vsyncadd [#allocation3], 4294959104 }
  0x35   :  { %3390 = dma.done.wait [#allocation5], 8192  }
  0x36   :  { %3391 = vsyncadd [#allocation5], 4294959104  ;;  %v3058_v0 = vld [vmem:[#allocation2 + $0x40] sm:$0xff]   ;;  %v3062_v4 = vld [vmem:[#allocation2 + $0x48] sm:$0xff]   ;;  %vm870_vm0 = vcmask 1043456  }
  0x37   :  { %v3059_v1 = vld [vmem:[#allocation2 + $0xc0] sm:$0xff]   ;;  %2798 = vmatprep.subr.bf16.mxu0 %v3058_v0  ;;  %v3063_v5 = vld [vmem:[#allocation2 + $0xc8] sm:$0xff]   ;;  %v3066_v8 = vld [vmem:[#allocation2 + $0x50] sm:$0xff]  }
  0x38   :  { %v3060_v2 = vld [vmem:[#allocation2] sm:$0xff]   ;;  %2826 = vmatprep.subr.bf16.mxu1 %v3059_v1  ;;  %v3064_v6 = vld [vmem:[#allocation2 + $0x8] sm:$0xff]   ;;  %v3067_v9 = vld [vmem:[#allocation2 + $0xd0] sm:$0xff]  }
  0x39   :  { %v3061_v3 = vld [vmem:[#allocation2 + $0x80] sm:$0xff]   ;;  %2799 = vmatpush3.bf16.msra.mxu0 %v3060_v2  ;;  %v3065_v7 = vld [vmem:[#allocation2 + $0x88] sm:$0xff]   ;;  %v3068_v10 = vld [vmem:[#allocation2 + $0x10] sm:$0xff]  }
  0x3a   :  { %2827 = vmatpush3.bf16.msra.mxu1 %v3061_v3  ;;  %2800 = vmatprep.subr.bf16.mxu0 %v3062_v4  ;;  %v3069_v11 = vld [vmem:[#allocation2 + $0x90] sm:$0xff]   ;;  %v3070_v12 = vld [vmem:[#allocation2 + $0x58] sm:$0xff]   ;;  %v3074_v16 = vld [vmem:[#allocation2 + $0x60] sm:$0xff]  }
  0x3b   :  { %2828 = vmatprep.subr.bf16.mxu1 %v3063_v5  ;;  %v3071_v13 = vld [vmem:[#allocation2 + $0xd8] sm:$0xff]   ;;  %v3075_v17 = vld [vmem:[#allocation2 + $0xe0] sm:$0xff]   ;;  %v3078_v20 = vld [vmem:[#allocation2 + $0x68] sm:$0xff]  }
  0x3c   :  { %v3072_v14 = vld [vmem:[#allocation2 + $0x18] sm:$0xff]   ;;  %v3076_v18 = vld [vmem:[#allocation2 + $0x20] sm:$0xff]   ;;  %v3079_v21 = vld [vmem:[#allocation2 + $0xe8] sm:$0xff]  }
  0x3d   :  { %2801 = vmatpush3.bf16.msra.mxu0 %v3064_v6  ;;  %v3073_v15 = vld [vmem:[#allocation2 + $0x98] sm:$0xff]   ;;  %v3077_v19 = vld [vmem:[#allocation2 + $0xa0] sm:$0xff]   ;;  %v3080_v22 = vld [vmem:[#allocation2 + $0x28] sm:$0xff]  }
  0x3e   :  { %2829 = vmatpush3.bf16.msra.mxu1 %v3065_v7  ;;  %2802 = vmatprep.subr.bf16.mxu0 %v3066_v8  ;;  %v3081_v23 = vld [vmem:[#allocation2 + $0xa8] sm:$0xff]   ;;  %v3082_v24 = vld [vmem:[#allocation2 + $0x70] sm:$0xff]   ;;  %v3086_v28 = vld [vmem:[#allocation2 + $0x78] sm:$0xff]  }
  0x3f   :  { %2830 = vmatprep.subr.bf16.mxu1 %v3067_v9  ;;  %v3083_v25 = vld [vmem:[#allocation2 + $0xf0] sm:$0xff]   ;;  %v3087_v29 = vld [vmem:[#allocation2 + $0xf8] sm:$0xff]   ;;  %v71_v32 = vld [vmem:[%s3873_s0] sm:$0xff] }
  0x40   :  { %v3084_v26 = vld [vmem:[#allocation2 + $0x30] sm:$0xff]   ;;  %v3088_v30 = vld [vmem:[#allocation2 + $0x38] sm:$0xff]   ;;  %v75_v33 = vld [vmem:[%s3873_s0 + $0x20] sm:$0xff] }
  0x41   :  { %2803 = vmatpush3.bf16.msra.mxu0 %v3068_v10  ;;  %v3085_v27 = vld [vmem:[#allocation2 + $0xb0] sm:$0xff]   ;;  %v3089_v31 = vld [vmem:[#allocation2 + $0xb8] sm:$0xff]   ;;  %v72_v34 = vld [vmem:[%s3873_s0 + $0x8] sm:$0xff]  ;;  %v2557_v35 = vcombine.low %v71_v32, %v75_v33  ;;  %v2558_v36 = vcombine.high %v71_v32, %v75_v33 }
  0x42   :  { %2831 = vmatpush3.bf16.msra.mxu1 %v3069_v11  ;;  %2804 = vmatprep.subr.bf16.mxu0 %v3070_v12  ;;  %v76_v37 = vld [vmem:[%s3873_s0 + $0x28] sm:$0xff]  ;;  %v3090_v40 = vld [vmem:[#allocation2 + $0x140] sm:$0xff]   ;;  %v3098_v48 = vld [vmem:[#allocation2 + $0x150] sm:$0xff]  }
  0x43   :  { %2832 = vmatprep.subr.bf16.mxu1 %v3071_v13  ;;  %v2559_v38 = vcombine.low %v72_v34, %v76_v37  ;;  %v2560_v39 = vcombine.high %v72_v34, %v76_v37  ;;  %702 = vmatprep.mubr.bf16.mxu0 %v2558_v36  ;;  %v3091_v41 = vld [vmem:[#allocation2 + $0x1c0] sm:$0xff]   ;;  %v3094_v44 = vld [vmem:[#allocation2 + $0x148] sm:$0xff]   ;;  %v3099_v49 = vld [vmem:[#allocation2 + $0x1d0] sm:$0xff]  }
  0x44   :  { %v3092_v42 = vld [vmem:[#allocation2 + $0x100] sm:$0xff]   ;;  %v3095_v45 = vld [vmem:[#allocation2 + $0x1c8] sm:$0xff]   ;;  %v3100_v50 = vld [vmem:[#allocation2 + $0x110] sm:$0xff]  }
  0x45   :  { %2805 = vmatpush3.bf16.msra.mxu0 %v3072_v14  ;;  %750 = vmatprep.mubr.bf16.mxu1 %v2560_v39  ;;  %v3093_v43 = vld [vmem:[#allocation2 + $0x180] sm:$0xff]   ;;  %v3096_v46 = vld [vmem:[#allocation2 + $0x108] sm:$0xff]   ;;  %v3101_v51 = vld [vmem:[#allocation2 + $0x190] sm:$0xff]  }
  0x46   :  { %2833 = vmatpush3.bf16.msra.mxu1 %v3073_v15  ;;  %2806 = vmatprep.subr.bf16.mxu0 %v3074_v16  ;;  %v3097_v47 = vld [vmem:[#allocation2 + $0x188] sm:$0xff]   ;;  %v3102_v52 = vld [vmem:[#allocation2 + $0x158] sm:$0xff]   ;;  %v3106_v56 = vld [vmem:[#allocation2 + $0x160] sm:$0xff]  }
  0x47   :  { %2834 = vmatprep.subr.bf16.mxu1 %v3075_v17  ;;  %v3103_v53 = vld [vmem:[#allocation2 + $0x1d8] sm:$0xff]   ;;  %v3107_v57 = vld [vmem:[#allocation2 + $0x1e0] sm:$0xff]   ;;  %v3111_v62 = vld [vmem:[#allocation2 + $0x168] sm:$0xff]  }
  0x48   :  { %v3104_v54 = vld [vmem:[#allocation2 + $0x118] sm:$0xff]   ;;  %v3108_v58 = vld [vmem:[#allocation2 + $0x120] sm:$0xff]   ;;  %v3112_v0 = vld [vmem:[#allocation2 + $0x1e8] sm:$0xff]  }
  0x49   :  { %2807 = vmatpush3.bf16.msra.mxu0 %v3076_v18  ;;  %v3105_v55 = vld [vmem:[#allocation2 + $0x198] sm:$0xff]   ;;  %v3109_v59 = vld [vmem:[#allocation2 + $0x1a0] sm:$0xff]   ;;  %v3114_v1 = vld [vmem:[#allocation2 + $0x128] sm:$0xff]  }
  0x4a   :  { %2835 = vmatpush3.bf16.msra.mxu1 %v3077_v19  ;;  %2808 = vmatprep.subr.bf16.mxu0 %v3078_v20  ;;  %v79_v60 = vld [vmem:[%s3873_s0 + $0x40] sm:$0xff]  ;;  %v3115_v2 = vld [vmem:[#allocation2 + $0x1a8] sm:$0xff]   ;;  %v3118_v6 = vld [vmem:[#allocation2 + $0x170] sm:$0xff]  }
  0x4b   :  { %2836 = vmatprep.subr.bf16.mxu1 %v3079_v21  ;;  %v2566_v61 = vcombine.high %v79_v60, %v79_v60  ;;  %v2565_v63 = vcombine.low %v79_v60, %v79_v60  ;;  %v80_v3 = vld [vmem:[%s3873_s0 + $0x48] sm:$0xff]  ;;  %v3119_v7 = vld [vmem:[#allocation2 + $0x1f0] sm:$0xff]   ;;  %v3122_v10 = vld [vmem:[#allocation2 + $0x178] sm:$0xff]  }
  0x4c   :  { %v2568_v4 = vcombine.high %v80_v3, %v80_v3  ;;  %v2567_v5 = vcombine.low %v80_v3, %v80_v3  ;;  %v3120_v8 = vld [vmem:[#allocation2 + $0x130] sm:$0xff]   ;;  %v3123_v11 = vld [vmem:[#allocation2 + $0x1f8] sm:$0xff]  }
  0x4d   :  { %2809 = vmatpush3.bf16.msra.mxu0 %v3080_v22  ;;  %v3121_v9 = vld [vmem:[#allocation2 + $0x1b0] sm:$0xff]   ;;  %v3124_v12 = vld [vmem:[#allocation2 + $0x138] sm:$0xff]  }
  0x4e   :  { %2837 = vmatpush3.bf16.msra.mxu1 %v3081_v23  ;;  %2810 = vmatprep.subr.bf16.mxu0 %v3082_v24  ;;  %v3125_v13 = vld [vmem:[#allocation2 + $0x1b8] sm:$0xff]   ;;  %v73_v14 = vld [vmem:[%s3873_s0 + $0x10] sm:$0xff] }
  0x4f   :  { %2838 = vmatprep.subr.bf16.mxu1 %v3083_v25  ;;  %v77_v15 = vld [vmem:[%s3873_s0 + $0x30] sm:$0xff]  ;;  %v74_v16 = vld [vmem:[%s3873_s0 + $0x18] sm:$0xff] }
  0x50   :  { %v2561_v17 = vcombine.low %v73_v14, %v77_v15  ;;  %v2562_v18 = vcombine.high %v73_v14, %v77_v15  ;;  %v78_v19 = vld [vmem:[%s3873_s0 + $0x38] sm:$0xff]  ;;  %v81_v20 = vld [vmem:[%s3873_s0 + $0x50] sm:$0xff] }
  0x51   :  { %2811 = vmatpush3.bf16.msra.mxu0 %v3084_v26  ;;  %v82_v21 = vld [vmem:[%s3873_s0 + $0x58] sm:$0xff]  ;;  %v2563_v22 = vcombine.low %v74_v16, %v78_v19  ;;  %v2564_v23 = vcombine.high %v74_v16, %v78_v19  ;;  %v2570_v24 = vcombine.high %v81_v20, %v81_v20  ;;  %v2569_v26 = vcombine.low %v81_v20, %v81_v20  ;;  %v3138_v32 = vld [vmem:[#allocation6 + $0x24] ss:$16 sps:$4 sm:$0xff]   ;;  %v3136_v34 = vld [vmem:[#allocation6 + $0x20] ss:$16 sps:$4 sm:$0xff]  }
  0x52   :  { %2839 = vmatpush3.bf16.msra.mxu1 %v3085_v27  ;;  %2812 = vmatprep.subr.bf16.mxu0 %v3086_v28  ;;  %v2572_v25 = vcombine.high %v82_v21, %v82_v21  ;;  %v2571_v27 = vcombine.low %v82_v21, %v82_v21  ;;  %v3132_v28 = vld [vmem:[#allocation6 + $0x4] ss:$16 sps:$4 sm:$0xff]   ;;  %v3141_v33 = vld [vmem:[#allocation6 + $0x2c] ss:$16 sps:$4 sm:$0xff]   ;;  %v3142_v36 = vld [vmem:[#allocation6 + $0x40] ss:$16 sps:$4 sm:$0xff]  }
  0x53   :  { %2840 = vmatprep.subr.bf16.mxu1 %v3087_v29  ;;  %v3135_v29 = vld [vmem:[#allocation6 + $0xc] ss:$16 sps:$4 sm:$0xff]   ;;  %v3144_v37 = vld [vmem:[#allocation6 + $0x44] ss:$16 sps:$4 sm:$0xff]  }
  0x54   :  { %v3147_v39 = vld [vmem:[#allocation6 + $0x4c] ss:$16 sps:$4 sm:$0xff]   ;;  %v3180_v60 = vld [vmem:[#allocation4 + $0x4] ss:$16 sps:$4 sm:$0xff]  }
  0x55   :  { %2813 = vmatpush3.bf16.msra.mxu0 %v3088_v30  ;;  %v3130_v30 = vld [vmem:[#allocation6] ss:$16 sps:$4 sm:$0xff]  }
  0x56   :  { %2841 = vmatpush3.bf16.msra.mxu1 %v3089_v31  ;;  %2854 = vmatprep.subr.bf16.mxu0 %v3090_v40  ;;  %v3133_v31 = vld [vmem:[#allocation6 + $0x8] ss:$16 sps:$4 sm:$0xff]   ;;  %v3150_v40 = vld [vmem:[#allocation6 + $0x64] ss:$16 sps:$4 sm:$0xff]  }
  0x57   :  { %2882 = vmatprep.subr.bf16.mxu1 %v3091_v41  ;;  %v3153_v41 = vld [vmem:[#allocation6 + $0x6c] ss:$16 sps:$4 sm:$0xff]  }
  0x58   :  { %703 = vmatmul.mubr.bf16.vlgmr.msra.gmra.mrb[0].mxu0 %v2557_v35  ;;  %v3139_v35 = vld [vmem:[#allocation6 + $0x28] ss:$16 sps:$4 sm:$0xff]  }
  0x59   :  { %751 = vmatmul.mubr.bf16.vlgmr.msra.gmra.mrb[0].mxu1 %v2559_v38  ;;  %2855 = vmatpush3.bf16.msra.mxu0 %v3092_v42  ;;  %v3145_v38 = vld [vmem:[#allocation6 + $0x48] ss:$16 sps:$4 sm:$0xff]   ;;  %v3148_v42 = vld [vmem:[#allocation6 + $0x60] ss:$16 sps:$4 sm:$0xff]  }
  0x5a   :  { %2883 = vmatpush3.bf16.msra.mxu1 %v3093_v43  ;;  %2856 = vmatprep.subr.bf16.mxu0 %v3094_v44  ;;  %v3151_v43 = vld [vmem:[#allocation6 + $0x68] ss:$16 sps:$4 sm:$0xff]   ;;  %v3156_v44 = vld [vmem:[#allocation6 + $0x84] ss:$16 sps:$4 sm:$0xff]  }
  0x5b   :  { %2884 = vmatprep.subr.bf16.mxu1 %v3095_v45  ;;  %710 = vmatprep.mubr.bf16.mxu0 %v2566_v61  ;;  %v3159_v45 = vld [vmem:[#allocation6 + $0x8c] ss:$16 sps:$4 sm:$0xff]   ;;  %v3399_v61 = vmov 0  }
  0x5c   :  { %758 = vmatprep.mubr.bf16.mxu1 %v2568_v4 }
  0x5d   :  { %2857 = vmatpush3.bf16.msra.mxu0 %v3096_v46  ;;  %v3154_v46 = vld [vmem:[#allocation6 + $0x80] ss:$16 sps:$4 sm:$0xff]  }
  0x5e   :  { %2885 = vmatpush3.bf16.msra.mxu1 %v3097_v47  ;;  %2858 = vmatprep.subr.bf16.mxu0 %v3098_v48  ;;  %v3157_v47 = vld [vmem:[#allocation6 + $0x88] ss:$16 sps:$4 sm:$0xff]   ;;  %v3162_v48 = vld [vmem:[#allocation6 + $0xa4] ss:$16 sps:$4 sm:$0xff]  }
  0x5f   :  { %2886 = vmatprep.subr.bf16.mxu1 %v3099_v49  ;;  %v3165_v49 = vld [vmem:[#allocation6 + $0xac] ss:$16 sps:$4 sm:$0xff]  }
  0x60   :  { %711 = vmatmul.mubr.bf16.gmra.mrb[4].mxu0 %v2565_v63 }
  0x61   :  { %2859 = vmatpush3.bf16.msra.mxu0 %v3100_v50  ;;  %759 = vmatmul.mubr.bf16.gmra.mrb[4].mxu1 %v2567_v5  ;;  %v3160_v50 = vld [vmem:[#allocation6 + $0xa0] ss:$16 sps:$4 sm:$0xff]  }
  0x62   :  { %2887 = vmatpush3.bf16.msra.mxu1 %v3101_v51  ;;  %2860 = vmatprep.subr.bf16.mxu0 %v3102_v52  ;;  %v3163_v51 = vld [vmem:[#allocation6 + $0xa8] ss:$16 sps:$4 sm:$0xff]   ;;  %v3168_v52 = vld [vmem:[#allocation6 + $0xc4] ss:$16 sps:$4 sm:$0xff]  }
  0x63   :  { %2888 = vmatprep.subr.bf16.mxu1 %v3103_v53  ;;  %798 = vmatprep.mubr.bf16.mxu0 %v2562_v18  ;;  %v3171_v53 = vld [vmem:[#allocation6 + $0xcc] ss:$16 sps:$4 sm:$0xff]  }
  0x64   :  { %846 = vmatprep.mubr.bf16.mxu1 %v2564_v23 }
  0x65   :  { %2861 = vmatpush3.bf16.msra.mxu0 %v3104_v54  ;;  %v3166_v54 = vld [vmem:[#allocation6 + $0xc0] ss:$16 sps:$4 sm:$0xff]  }
  0x66   :  { %2889 = vmatpush3.bf16.msra.mxu1 %v3105_v55  ;;  %2862 = vmatprep.subr.bf16.mxu0 %v3106_v56  ;;  %v3169_v55 = vld [vmem:[#allocation6 + $0xc8] ss:$16 sps:$4 sm:$0xff]   ;;  %v3174_v56 = vld [vmem:[#allocation6 + $0xe4] ss:$16 sps:$4 sm:$0xff]  }
  0x67   :  { %2890 = vmatprep.subr.bf16.mxu1 %v3107_v57  ;;  %v3177_v57 = vld [vmem:[#allocation6 + $0xec] ss:$16 sps:$4 sm:$0xff]  }
  0x69   :  { %2863 = vmatpush3.bf16.msra.mxu0 %v3108_v58  ;;  %v3172_v58 = vld [vmem:[#allocation6 + $0xe0] ss:$16 sps:$4 sm:$0xff]  }
  0x6a   :  { %2891 = vmatpush3.bf16.msra.mxu1 %v3109_v59  ;;  %2864 = vmatprep.subr.bf16.mxu0 %v3111_v62  ;;  %v3175_v59 = vld [vmem:[#allocation6 + $0xe8] ss:$16 sps:$4 sm:$0xff]   ;;  %v3183_v62 = vld [vmem:[#allocation4 + $0xc] ss:$16 sps:$4 sm:$0xff]  }
  0x6b   :  { %2892 = vmatprep.subr.bf16.mxu1 %v3112_v0 }
  0x6d   :  { %2865 = vmatpush3.bf16.msra.mxu0 %v3114_v1  ;;  %v2556_v1 = vld [vmem:[%s3875_s2] ss:$0 sm:$0xff] }
  0x6e   :  { %2893 = vmatpush3.bf16.msra.mxu1 %v3115_v2  ;;  %2866 = vmatprep.subr.bf16.mxu0 %v3118_v6 }
  0x6f   :  { %2894 = vmatprep.subr.bf16.mxu1 %v3119_v7 }
  0x71   :  { %2867 = vmatpush3.bf16.msra.mxu0 %v3120_v8 }
  0x72   :  { %2895 = vmatpush3.bf16.msra.mxu1 %v3121_v9  ;;  %2868 = vmatprep.subr.bf16.mxu0 %v3122_v10 }
  0x73   :  { %2896 = vmatprep.subr.bf16.mxu1 %v3123_v11 }
  0x75   :  { %2869 = vmatpush3.bf16.msra.mxu0 %v3124_v12 }
  0x76   :  { %2897 = vmatpush3.bf16.msra.mxu1 %v3125_v13  ;;  %1104 = vmatprep.subr.bf16.mxu0 %v3132_v28 }
  0x77   :  { %1155 = vmatprep.subr.bf16.mxu1 %v3135_v29 }
  0x78   :  { %799 = vmatmul.mubr.bf16.vlgmr.msra.gmra.mrb[8].mxu0 %v2561_v17 }
  0x79   :  { %847 = vmatmul.mubr.bf16.vlgmr.msra.gmra.mrb[8].mxu1 %v2563_v22  ;;  %806 = vmatprep.mubr.bf16.mxu0 %v2570_v24 }
  0x7a   :  { %854 = vmatprep.mubr.bf16.mxu1 %v2572_v25  ;;  %1105 = vmatpush1.bf16.msra.mxu0 %v3130_v30 }
  0x7b   :  { %1156 = vmatpush1.bf16.msra.mxu1 %v3133_v31  ;;  %1106 = vmatprep.subr.bf16.mxu0 %v3138_v32 }
  0x7c   :  { %1157 = vmatprep.subr.bf16.mxu1 %v3141_v33 }
  0x7e   :  { %1107 = vmatpush1.bf16.msra.mxu0 %v3136_v34 }
  0x7f   :  { %1158 = vmatpush1.bf16.msra.mxu1 %v3139_v35  ;;  %1108 = vmatprep.subr.bf16.mxu0 %v3144_v37 }
  0x80   :  { %807 = vmatmul.mubr.bf16.gmra.mrb[12].mxu0 %v2569_v26  ;;  %1159 = vmatprep.subr.bf16.mxu1 %v3147_v39 }
  0x81   :  { %855 = vmatmul.mubr.bf16.gmra.mrb[12].mxu1 %v2571_v27  ;;  %1136 = vmatprep.mubr.bf16.mxu0 %v3399_v61 }
  0x82   :  { %1109 = vmatpush1.bf16.msra.mxu0 %v3142_v36  ;;  %1187 = vmatprep.mubr.bf16.mxu1 %v3399_v61 }
  0x83   :  { %1160 = vmatpush1.bf16.msra.mxu1 %v3145_v38  ;;  %1110 = vmatprep.subr.bf16.mxu0 %v3150_v40 }
  0x84   :  { %1161 = vmatprep.subr.bf16.mxu1 %v3153_v41 }
  0x86   :  { %1111 = vmatpush1.bf16.msra.mxu0 %v3148_v42 }
  0x87   :  { %1162 = vmatpush1.bf16.msra.mxu1 %v3151_v43  ;;  %1112 = vmatprep.subr.bf16.mxu0 %v3156_v44 }
  0x88   :  { %1163 = vmatprep.subr.bf16.mxu1 %v3159_v45 }
  0x8a   :  { %1113 = vmatpush1.bf16.msra.mxu0 %v3154_v46 }
  0x8b   :  { %1164 = vmatpush1.bf16.msra.mxu1 %v3157_v47  ;;  %1114 = vmatprep.subr.bf16.mxu0 %v3162_v48 }
  0x8c   :  { %1165 = vmatprep.subr.bf16.mxu1 %v3165_v49 }
  0x8e   :  { %1115 = vmatpush1.bf16.msra.mxu0 %v3160_v50 }
  0x8f   :  { %1166 = vmatpush1.bf16.msra.mxu1 %v3163_v51  ;;  %1116 = vmatprep.subr.bf16.mxu0 %v3168_v52 }
  0x90   :  { %1167 = vmatprep.subr.bf16.mxu1 %v3171_v53 }
  0x92   :  { %1117 = vmatpush1.bf16.msra.mxu0 %v3166_v54 }
  0x93   :  { %1168 = vmatpush1.bf16.msra.mxu1 %v3169_v55  ;;  %1118 = vmatprep.subr.bf16.mxu0 %v3174_v56 }
  0x94   :  { %1169 = vmatprep.subr.bf16.mxu1 %v3177_v57 }
  0x96   :  { %1119 = vmatpush1.bf16.msra.mxu0 %v3172_v58 }
  0x97   :  { %1170 = vmatpush1.bf16.msra.mxu1 %v3175_v59  ;;  %1366 = vmatprep.subr.bf16.mxu0 %v3180_v60 }
  0x98   :  { %1417 = vmatprep.subr.bf16.mxu1 %v3183_v62 }
 0x12b   :  { %v2814_v63 = vpop.f32.mrb[0].mxu0 }
 0x12c   :  { %v2842_v0 = vpop.f32.mrb[0].mxu1  ;;  %v2815_v2 = vpop.f32.mrb[1].mxu0 }
 0x12d   :  { %v2816_v3 = vadd.f32 %v2815_v2, %v2814_v63  ;;  %v2843_v4 = vpop.f32.mrb[1].mxu1  ;;  %v2817_v5 = vpop.f32.mrb[2].mxu0  ;;  %v3186_v2 = vld [vmem:[#allocation4 + $0x24] ss:$16 sps:$4 sm:$0xff]  }
 0x12e   :  { %v2844_v6 = vadd.f32 %v2843_v4, %v2842_v0  ;;  %v2845_v7 = vpop.f32.mrb[2].mxu1  ;;  %v2818_v8 = vpop.f32.mrb[3].mxu0  ;;  %v3178_v0 = vld [vmem:[#allocation4] ss:$16 sps:$4 sm:$0xff]  }
 0x12f   :  { %v705_v9 = vadd.f32 %v2816_v3, %v2556_v1  ;;  %v2819_v10 = vadd.f32 %v2818_v8, %v2817_v5  ;;  %v2846_v11 = vpop.f32.mrb[3].mxu1  ;;  %v3189_v3 = vld [vmem:[#allocation4 + $0x2c] ss:$16 sps:$4 sm:$0xff]   ;;  %v3184_v5 = vld [vmem:[#allocation4 + $0x20] ss:$16 sps:$4 sm:$0xff]  }
 0x130   :  { %v2847_v12 = vadd.f32 %v2846_v11, %v2845_v7  ;;  %v3192_v7 = vld [vmem:[#allocation4 + $0x44] ss:$16 sps:$4 sm:$0xff]   ;;  %v3195_v8 = vld [vmem:[#allocation4 + $0x4c] ss:$16 sps:$4 sm:$0xff]  }
 0x131   :  { %v753_v13 = vadd.f32 %v2844_v6, %v705_v9  ;;  %v708_v14 = vadd.f32 %v2819_v10, %v2556_v1  ;;  %v3187_v6 = vld [vmem:[#allocation4 + $0x28] ss:$16 sps:$4 sm:$0xff]   ;;  %v3190_v9 = vld [vmem:[#allocation4 + $0x40] ss:$16 sps:$4 sm:$0xff]   ;;  %v3198_v11 = vld [vmem:[#allocation4 + $0x64] ss:$16 sps:$4 sm:$0xff]  }
 0x132   :  { %v3193_v10 = vld [vmem:[#allocation4 + $0x48] ss:$16 sps:$4 sm:$0xff]  }
 0x133   :  { %v756_v15 = vadd.f32 %v2847_v12, %v708_v14  ;;  %v2820_v16 = vpop.f32.mrb[4].mxu0  ;;  %v3201_v12 = vld [vmem:[#allocation4 + $0x6c] ss:$16 sps:$4 sm:$0xff]   ;;  %v3199_v14 = vld [vmem:[#allocation4 + $0x68] ss:$16 sps:$4 sm:$0xff]  }
 0x134   :  { %v2821_v17 = vpop.f32.mrb[5].mxu0  ;;  %v2848_v22 = vpop.f32.mrb[4].mxu1 }
 0x135   :  { %v2822_v18 = vadd.f32 %v2821_v17, %v2820_v16  ;;  %v2823_v19 = vpop.f32.mrb[6].mxu0  ;;  %v2849_v23 = vpop.f32.mrb[5].mxu1  ;;  %v3207_v16 = vld [vmem:[#allocation4 + $0x8c] ss:$16 sps:$4 sm:$0xff]   ;;  %v3202_v17 = vld [vmem:[#allocation4 + $0x80] ss:$16 sps:$4 sm:$0xff]  }
 0x136   :  { %v2824_v20 = vpop.f32.mrb[7].mxu0  ;;  %v2850_v24 = vadd.f32 %v2849_v23, %v2848_v22  ;;  %v2851_v25 = vpop.f32.mrb[6].mxu1  ;;  %v3210_v19 = vld [vmem:[#allocation4 + $0xa4] ss:$16 sps:$4 sm:$0xff]   ;;  %v3211_v22 = vld [vmem:[#allocation4 + $0xa8] ss:$16 sps:$4 sm:$0xff]  }
 0x137   :  { %v713_v21 = vadd.f32 %v2822_v18, %v2556_v1  ;;  %v2852_v26 = vpop.f32.mrb[7].mxu1  ;;  %v3181_v1 = vld [vmem:[#allocation4 + $0x8] ss:$16 sps:$4 sm:$0xff]   ;;  %v3213_v20 = vld [vmem:[#allocation4 + $0xac] ss:$16 sps:$4 sm:$0xff]  }
 0x138   :  { %v3205_v18 = vld [vmem:[#allocation4 + $0x88] ss:$16 sps:$4 sm:$0xff]   ;;  %v3216_v23 = vld [vmem:[#allocation4 + $0xc4] ss:$16 sps:$4 sm:$0xff]   ;;  %v3214_v25 = vld [vmem:[#allocation4 + $0xc0] ss:$16 sps:$4 sm:$0xff]  }
 0x139   :  { %v761_v27 = vadd.f32 %v2850_v24, %v713_v21  ;;  %v3208_v21 = vld [vmem:[#allocation4 + $0xa0] ss:$16 sps:$4 sm:$0xff]   ;;  %v3219_v24 = vld [vmem:[#allocation4 + $0xcc] ss:$16 sps:$4 sm:$0xff]   ;;  %v3217_v26 = vld [vmem:[#allocation4 + $0xc8] ss:$16 sps:$4 sm:$0xff]  }
 0x14b   :  { %v2870_v28 = vpop.f32.mrb[8].mxu0 }
 0x14c   :  { %v2898_v29 = vpop.f32.mrb[8].mxu1  ;;  %v2871_v30 = vpop.f32.mrb[9].mxu0 }
 0x14d   :  { %v2872_v31 = vadd.f32 %v2871_v30, %v2870_v28  ;;  %v2899_v32 = vpop.f32.mrb[9].mxu1  ;;  %v2873_v33 = vpop.f32.mrb[10].mxu0  ;;  %v3225_v28 = vld [vmem:[#allocation4 + $0xec] ss:$16 sps:$4 sm:$0xff]   ;;  %v3223_v30 = vld [vmem:[#allocation4 + $0xe8] ss:$16 sps:$4 sm:$0xff]  }
 0x14e   :  { %v2900_v34 = vadd.f32 %v2899_v32, %v2898_v29  ;;  %v2901_v35 = vpop.f32.mrb[10].mxu1  ;;  %v2874_v36 = vpop.f32.mrb[11].mxu0  ;;  %v3220_v29 = vld [vmem:[#allocation4 + $0xe0] ss:$16 sps:$4 sm:$0xff]  }
 0x14f   :  { %v801_v37 = vadd.f32 %v2872_v31, %v753_v13  ;;  %v2875_v38 = vadd.f32 %v2874_v36, %v2873_v33  ;;  %v2902_v39 = vpop.f32.mrb[11].mxu1  ;;  %v3196_v13 = vld [vmem:[#allocation4 + $0x60] ss:$16 sps:$4 sm:$0xff]   ;;  %v3231_v36 = vld [vmem:[%s3879_s6 + $0xc8] sm:$0xff]  }
 0x150   :  { %v2903_v40 = vadd.f32 %v2902_v39, %v2901_v35  ;;  %v3226_v32 = vld [vmem:[%s3879_s6 + $0x40] sm:$0xff]   ;;  %v3230_v35 = vld [vmem:[%s3879_s6 + $0x48] sm:$0xff]   ;;  %v3234_v39 = vld [vmem:[%s3879_s6 + $0x50] sm:$0xff]  }
 0x151   :  { %v849_v41 = vadd.f32 %v2900_v34, %v801_v37  ;;  %v804_v42 = vadd.f32 %v2875_v38, %v756_v15  ;;  %v3204_v15 = vld [vmem:[#allocation4 + $0x84] ss:$16 sps:$4 sm:$0xff]   ;;  %v3232_v37 = vld [vmem:[%s3879_s6 + $0x8] sm:$0xff]  }
 0x152   :  { %v3227_v33 = vld [vmem:[%s3879_s6 + $0xc0] sm:$0xff]   ;;  %v3233_v38 = vld [vmem:[%s3879_s6 + $0x88] sm:$0xff]  }
 0x153   :  { %v852_v43 = vadd.f32 %v2903_v40, %v804_v42  ;;  %v2876_v44 = vpop.f32.mrb[12].mxu0  ;;  %v862_v47 = vmax.f32 %v849_v41, 0.0  ;;  %v3228_v34 = vld [vmem:[%s3879_s6] sm:$0xff]   ;;  %v3235_v40 = vld [vmem:[%s3879_s6 + $0xd0] sm:$0xff]  }
 0x154   :  { %v2904_v45 = vpop.f32.mrb[12].mxu1  ;;  %v2877_v46 = vpop.f32.mrb[13].mxu0  ;;  %v3236_v41 = vld [vmem:[%s3879_s6 + $0x10] sm:$0xff]  }
 0x155   :  { %v863_v48 = vmax.f32 %v852_v43, 0.0  ;;  %v2878_v49 = vadd.f32 %v2877_v46, %v2876_v44  ;;  %v2905_v50 = vpop.f32.mrb[13].mxu1  ;;  %v2879_v51 = vpop.f32.mrb[14].mxu0  ;;  %v3237_v42 = vld [vmem:[%s3879_s6 + $0x90] sm:$0xff]   ;;  %v3238_v43 = vld [vmem:[%s3879_s6 + $0x58] sm:$0xff]  }
 0x156   :  { %v2906_v52 = vadd.f32 %v2905_v50, %v2904_v45  ;;  %v2907_v53 = vpop.f32.mrb[14].mxu1  ;;  %v2880_v54 = vpop.f32.mrb[15].mxu0  ;;  %v3239_v44 = vld [vmem:[%s3879_s6 + $0xd8] sm:$0xff]   ;;  %v3245_v50 = vld [vmem:[%s3879_s6 + $0xa0] sm:$0xff]   ;;  %v3246_v51 = vld [vmem:[%s3879_s6 + $0x68] sm:$0xff]  }
 0x157   :  { %v3528_v55 = vpack.c.bf16 %v863_v48, %v862_v47  ;;  %v809_v56 = vadd.f32 %v2878_v49, %v761_v27  ;;  %v2908_v57 = vpop.f32.mrb[15].mxu1  ;;  %v3222_v27 = vld [vmem:[#allocation4 + $0xe4] ss:$16 sps:$4 sm:$0xff]   ;;  %v3240_v45 = vld [vmem:[%s3879_s6 + $0x18] sm:$0xff]   ;;  %v3248_v53 = vld [vmem:[%s3879_s6 + $0x28] sm:$0xff]  }
 0x158   :  { %v3241_v46 = vld [vmem:[%s3879_s6 + $0x98] sm:$0xff]   ;;  %v3242_v47 = vld [vmem:[%s3879_s6 + $0x60] sm:$0xff]   ;;  %v3249_v54 = vld [vmem:[%s3879_s6 + $0xa8] sm:$0xff]  }
 0x159   :  { %v857_v58 = vadd.f32 %v2906_v52, %v809_v56  ;;  %v3531_v62 = vrot.slane %v3528_v55, 4  ;;  %v3243_v48 = vld [vmem:[%s3879_s6 + $0xe0] sm:$0xff]   ;;  %v3247_v52 = vld [vmem:[%s3879_s6 + $0xe8] sm:$0xff]   ;;  %v3251_v56 = vld [vmem:[%s3879_s6 + $0xf0] sm:$0xff]  }
 0x15a   :  { %v3244_v49 = vld [vmem:[%s3879_s6 + $0x20] sm:$0xff]   ;;  %v3252_v57 = vld [vmem:[%s3879_s6 + $0x30] sm:$0xff]  }
 0x15b   :  { %v864_v59 = vmax.f32 %v857_v58, 0.0  ;;  %v873_v31 = vsel %vm870_vm0, %v3528_v55, %v3531_v62  ;;  %v3250_v55 = vld [vmem:[%s3879_s6 + $0x70] sm:$0xff]  }
 0x15c   :  { %v3253_v58 = vld [vmem:[%s3879_s6 + $0xb0] sm:$0xff]  }
 0x15d   :  { %v866_v60 = vpack.c.bf16 %v864_v59, %v864_v59  ;;  %v3254_v59 = vld [vmem:[%s3879_s6 + $0x78] sm:$0xff]  }
 0x15f   :  { %v876_v63 = vrot.slane %v866_v60, 4 }
 0x161   :  { %v878_v4 = vsel %vm870_vm0, %v3531_v62, %v876_v63  ;;  %v3257_v63 = vld [vmem:[%s3879_s6 + $0xb8] sm:$0xff]  }
 0x162   :  { %1137 = vmatmul.mubr.bf16.vlgmr.msra.gmra.mrb[16].mxu0 %v878_v4  ;;  %1188 = vmatmul.mubr.bf16.vlgmr.msra.gmra.mrb[16].mxu1 %v878_v4 }
 0x163   :  { %1367 = vmatpush1.bf16.msra.mxu0 %v3178_v0  ;;  %1418 = vmatpush1.bf16.msra.mxu1 %v3181_v1  ;;  %v3258_v0 = vld [vmem:[%s3879_s6 + $0x140] sm:$0xff]  }
 0x164   :  { %1368 = vmatprep.subr.bf16.mxu0 %v3186_v2  ;;  %1419 = vmatprep.subr.bf16.mxu1 %v3189_v3  ;;  %v3259_v1 = vld [vmem:[%s3879_s6 + $0x1c0] sm:$0xff]  }
 0x165   :  { %1146 = vmatprep.mubr.bf16.mxu0 %v3399_v61  ;;  %1197 = vmatprep.mubr.bf16.mxu1 %v3399_v61 }
 0x167   :  { %1369 = vmatpush1.bf16.msra.mxu0 %v3184_v5  ;;  %1420 = vmatpush1.bf16.msra.mxu1 %v3187_v6 }
 0x168   :  { %1370 = vmatprep.subr.bf16.mxu0 %v3192_v7  ;;  %1421 = vmatprep.subr.bf16.mxu1 %v3195_v8 }
 0x16a   :  { %1147 = vmatmul.mubr.bf16.gmra.mrb[20].mxu0 %v866_v60  ;;  %1198 = vmatmul.mubr.bf16.gmra.mrb[20].mxu1 %v866_v60  ;;  %v3255_v60 = vld [vmem:[%s3879_s6 + $0xf8] sm:$0xff]  }
 0x16b   :  { %1371 = vmatpush1.bf16.msra.mxu0 %v3190_v9  ;;  %1422 = vmatpush1.bf16.msra.mxu1 %v3193_v10  ;;  %v1470_v10 = vlaneseq }
 0x16c   :  { %1372 = vmatprep.subr.bf16.mxu0 %v3198_v11  ;;  %1423 = vmatprep.subr.bf16.mxu1 %v3201_v12 }
 0x16d   :  { %1398 = vmatprep.mubr.bf16.mxu0 %v3399_v61  ;;  %1449 = vmatprep.mubr.bf16.mxu1 %v3399_v61  ;;  %v1471_v11 = vshrl.u32 %v1470_v10, 7  ;;  %v3269_v10 = vld [vmem:[%s3879_s6 + $0x190] sm:$0xff]  }
 0x16f   :  { %1373 = vmatpush1.bf16.msra.mxu0 %v3196_v13  ;;  %1424 = vmatpush1.bf16.msra.mxu1 %v3199_v14  ;;  %v1472_v12 = vsub.s32 0, %v1471_v11  ;;  %v1480_v13 = vsub.s32 2, %v1471_v11  ;;  %v1468_v14 = vld [vmem:[%s3878_s5] sm:$0xf] }
 0x170   :  { %1374 = vmatprep.subr.bf16.mxu0 %v3204_v15  ;;  %1425 = vmatprep.subr.bf16.mxu1 %v3207_v16  ;;  %v1476_v15 = vsub.s32 1, %v1471_v11  ;;  %v1484_v16 = vsub.s32 3, %v1471_v11  ;;  %v3270_v11 = vld [vmem:[%s3879_s6 + $0x158] sm:$0xff]  }
 0x173   :  { %1375 = vmatpush1.bf16.msra.mxu0 %v3202_v17  ;;  %1426 = vmatpush1.bf16.msra.mxu1 %v3205_v18  ;;  %v1473_v17 = vrot.slane %v1468_v14, %v1472_v12  ;;  %v1481_v18 = vrot.slane %v1468_v14, %v1480_v13  ;;  %v3271_v12 = vld [vmem:[%s3879_s6 + $0x1d8] sm:$0xff]  }
 0x174   :  { %1376 = vmatprep.subr.bf16.mxu0 %v3210_v19  ;;  %1427 = vmatprep.subr.bf16.mxu1 %v3213_v20  ;;  %v3651_v19 = vrot.slane %v1468_v14, %v1476_v15  ;;  %v3653_v20 = vrot.slane %v1468_v14, %v1484_v16  ;;  %v3272_v13 = vld [vmem:[%s3879_s6 + $0x118] sm:$0xff]   ;;  %v3274_v15 = vld [vmem:[%s3879_s6 + $0x160] sm:$0xff]  }
 0x175   :  { %v3273_v14 = vld [vmem:[%s3879_s6 + $0x198] sm:$0xff]   ;;  %v3275_v16 = vld [vmem:[%s3879_s6 + $0x1e0] sm:$0xff]  }
 0x177   :  { %1377 = vmatpush1.bf16.msra.mxu0 %v3208_v21  ;;  %1428 = vmatpush1.bf16.msra.mxu1 %v3211_v22 }
 0x178   :  { %1378 = vmatprep.subr.bf16.mxu0 %v3216_v23  ;;  %1429 = vmatprep.subr.bf16.mxu1 %v3219_v24 }
 0x17b   :  { %1379 = vmatpush1.bf16.msra.mxu0 %v3214_v25  ;;  %1430 = vmatpush1.bf16.msra.mxu1 %v3217_v26 }
 0x17c   :  { %1380 = vmatprep.subr.bf16.mxu0 %v3222_v27  ;;  %1431 = vmatprep.subr.bf16.mxu1 %v3225_v28 }
 0x17f   :  { %1381 = vmatpush1.bf16.msra.mxu0 %v3220_v29  ;;  %1432 = vmatpush1.bf16.msra.mxu1 %v3223_v30 }
 0x180   :  { %2910 = vmatprep.subr.bf16.mxu0 %v3226_v32  ;;  %2932 = vmatprep.subr.bf16.mxu1 %v3227_v33 }
 0x182   :  { %1399 = vmatmul.mubr.bf16.vlgmr.msra.gmra.mrb[16].mxu0 %v873_v31  ;;  %1450 = vmatmul.mubr.bf16.vlgmr.msra.gmra.mrb[16].mxu1 %v873_v31 }
 0x183   :  { %1408 = vmatprep.mubr.bf16.mxu0 %v3399_v61  ;;  %1459 = vmatprep.mubr.bf16.mxu1 %v3399_v61  ;;  %v3229_v61 = vld [vmem:[%s3879_s6 + $0x80] sm:$0xff]  }
 0x184   :  { %2911 = vmatpush3.bf16.msra.mxu0 %v3228_v34  ;;  %2933 = vmatpush3.bf16.msra.mxu1 %v3229_v61 }
 0x185   :  { %2912 = vmatprep.subr.bf16.mxu0 %v3230_v35  ;;  %2934 = vmatprep.subr.bf16.mxu1 %v3231_v36 }
 0x188   :  { %2913 = vmatpush3.bf16.msra.mxu0 %v3232_v37  ;;  %2935 = vmatpush3.bf16.msra.mxu1 %v3233_v38 }
 0x189   :  { %2914 = vmatprep.subr.bf16.mxu0 %v3234_v39  ;;  %2936 = vmatprep.subr.bf16.mxu1 %v3235_v40 }
 0x18a   :  { %1409 = vmatmul.mubr.bf16.gmra.mrb[24].mxu0 %v3531_v62  ;;  %1460 = vmatmul.mubr.bf16.gmra.mrb[24].mxu1 %v3531_v62  ;;  %v3256_v62 = vld [vmem:[%s3879_s6 + $0x38] sm:$0xff]  }
 0x18c   :  { %2915 = vmatpush3.bf16.msra.mxu0 %v3236_v41  ;;  %2937 = vmatpush3.bf16.msra.mxu1 %v3237_v42 }
 0x18d   :  { %2916 = vmatprep.subr.bf16.mxu0 %v3238_v43  ;;  %2938 = vmatprep.subr.bf16.mxu1 %v3239_v44 }
 0x190   :  { %2917 = vmatpush3.bf16.msra.mxu0 %v3240_v45  ;;  %2939 = vmatpush3.bf16.msra.mxu1 %v3241_v46 }
 0x191   :  { %2918 = vmatprep.subr.bf16.mxu0 %v3242_v47  ;;  %2940 = vmatprep.subr.bf16.mxu1 %v3243_v48 }
 0x194   :  { %2919 = vmatpush3.bf16.msra.mxu0 %v3244_v49  ;;  %2941 = vmatpush3.bf16.msra.mxu1 %v3245_v50  ;;  %v3260_v50 = vld [vmem:[%s3879_s6 + $0x100] sm:$0xff]  }
 0x195   :  { %2920 = vmatprep.subr.bf16.mxu0 %v3246_v51  ;;  %2942 = vmatprep.subr.bf16.mxu1 %v3247_v52  ;;  %v3261_v51 = vld [vmem:[%s3879_s6 + $0x180] sm:$0xff]  }
 0x198   :  { %2921 = vmatpush3.bf16.msra.mxu0 %v3248_v53  ;;  %2943 = vmatpush3.bf16.msra.mxu1 %v3249_v54 }
 0x199   :  { %2922 = vmatprep.subr.bf16.mxu0 %v3250_v55  ;;  %2944 = vmatprep.subr.bf16.mxu1 %v3251_v56 }
 0x19c   :  { %2923 = vmatpush3.bf16.msra.mxu0 %v3252_v57  ;;  %2945 = vmatpush3.bf16.msra.mxu1 %v3253_v58 }
 0x19d   :  { %2924 = vmatprep.subr.bf16.mxu0 %v3254_v59  ;;  %2946 = vmatprep.subr.bf16.mxu1 %v3255_v60 }
 0x1a0   :  { %2925 = vmatpush3.bf16.msra.mxu0 %v3256_v62  ;;  %2947 = vmatpush3.bf16.msra.mxu1 %v3257_v63  ;;  %v3262_v63 = vld [vmem:[%s3879_s6 + $0x148] sm:$0xff]  }
 0x1a1   :  { %2954 = vmatprep.subr.bf16.mxu0 %v3258_v0  ;;  %2976 = vmatprep.subr.bf16.mxu1 %v3259_v1  ;;  %v3263_v0 = vld [vmem:[%s3879_s6 + $0x1c8] sm:$0xff]  }
 0x23d   :  { %v1148_v2 = vpop.f32.mrb[20].mxu0  ;;  %v1199_v3 = vpop.f32.mrb[20].mxu1 }
 0x23e   :  { %v1150_v4 = vpop.f32.mrb[21].mxu0  ;;  %v1201_v5 = vpop.f32.mrb[21].mxu1 }
 0x23f   :  { %v1152_v6 = vpop.f32.mrb[22].mxu0  ;;  %v1203_v7 = vpop.f32.mrb[22].mxu1 }
 0x240   :  { %v1153_v8 = vpop.f32.mrb[23].mxu0  ;;  %v1204_v9 = vpop.f32.mrb[23].mxu1  ;;  %v3265_v6 = vld [vmem:[%s3879_s6 + $0x188] sm:$0xff]   ;;  %v3266_v7 = vld [vmem:[%s3879_s6 + $0x150] sm:$0xff]  }
 0x241   :  { %v3267_v8 = vld [vmem:[%s3879_s6 + $0x1d0] sm:$0xff]  }
 0x242   :  { %v3268_v9 = vld [vmem:[%s3879_s6 + $0x110] sm:$0xff]  }
 0x255   :  { %v1400_v21 = vpop.f32.mrb[16].mxu0  ;;  %v1451_v22 = vpop.f32.mrb[16].mxu1 }
 0x256   :  { %v1490_v23 = vadd.f32 %v1473_v17, %v1400_v21  ;;  %v1492_v24 = vadd.f32 %v1481_v18, %v1451_v22  ;;  %v1402_v25 = vpop.f32.mrb[17].mxu0  ;;  %v1453_v26 = vpop.f32.mrb[17].mxu1  ;;  %v3278_v21 = vld [vmem:[%s3879_s6 + $0x168] sm:$0xff]  }
 0x257   :  { %v1491_v27 = vadd.f32 %v3651_v19, %v1402_v25  ;;  %v1493_v28 = vadd.f32 %v3653_v20, %v1453_v26  ;;  %v1404_v29 = vpop.f32.mrb[18].mxu0  ;;  %v1455_v30 = vpop.f32.mrb[18].mxu1  ;;  %v3279_v22 = vld [vmem:[%s3879_s6 + $0x1e8] sm:$0xff]   ;;  %v3282_v25 = vld [vmem:[%s3879_s6 + $0x170] sm:$0xff]  }
 0x258   :  { %v1494_v31 = vadd.f32 %v1473_v17, %v1404_v29  ;;  %v1496_v32 = vadd.f32 %v1481_v18, %v1455_v30  ;;  %v1406_v33 = vpop.f32.mrb[19].mxu0  ;;  %v1457_v34 = vpop.f32.mrb[19].mxu1  ;;  %v1502_v36 = vmax.f32 %v1490_v23, 0.0  ;;  %v1504_v37 = vmax.f32 %v1492_v24, 0.0  ;;  %v3280_v23 = vld [vmem:[%s3879_s6 + $0x128] sm:$0xff]   ;;  %v3283_v26 = vld [vmem:[%s3879_s6 + $0x1f0] sm:$0xff]  }
 0x259   :  { %v1495_v61 = vadd.f32 %v3651_v19, %v1406_v33  ;;  %v1497_v35 = vadd.f32 %v3653_v20, %v1457_v34  ;;  %v1503_v40 = vmax.f32 %v1491_v27, 0.0  ;;  %v1505_v41 = vmax.f32 %v1493_v28, 0.0  ;;  %v3281_v24 = vld [vmem:[%s3879_s6 + $0x1a8] sm:$0xff]   ;;  %v3284_v27 = vld [vmem:[%s3879_s6 + $0x130] sm:$0xff]   ;;  %v3286_v29 = vld [vmem:[%s3879_s6 + $0x178] sm:$0xff]  }
 0x25a   :  { %v1506_v38 = vmax.f32 %v1494_v31, 0.0  ;;  %v1508_v39 = vmax.f32 %v1496_v32, 0.0  ;;  %v3285_v28 = vld [vmem:[%s3879_s6 + $0x1b0] sm:$0xff]   ;;  %v3287_v30 = vld [vmem:[%s3879_s6 + $0x1f8] sm:$0xff]  }
 0x25b   :  { %v1507_v42 = vmax.f32 %v1495_v61, 0.0  ;;  %v1509_v43 = vmax.f32 %v1497_v35, 0.0  ;;  %v3288_v33 = vld [vmem:[%s3879_s6 + $0x138] sm:$0xff]   ;;  %v3290_v61 = vld [vmem:[%s3879_s6 + $0x240] sm:$0xff]  }
 0x25c   :  { %v3659_v44 = vpack.c.bf16 %v1506_v38, %v1502_v36  ;;  %v3661_v45 = vpack.c.bf16 %v1508_v39, %v1504_v37  ;;  %v3289_v34 = vld [vmem:[%s3879_s6 + $0x1b8] sm:$0xff]   ;;  %v3292_v36 = vld [vmem:[%s3879_s6 + $0x200] sm:$0xff]  }
 0x25d   :  { %v1515_v46 = vpack.c.bf16 %v1507_v42, %v1503_v40  ;;  %v1517_v47 = vpack.c.bf16 %v1509_v43, %v1505_v41  ;;  %v1410_v48 = vpop.f32.mrb[24].mxu0  ;;  %v1461_v49 = vpop.f32.mrb[24].mxu1  ;;  %v3293_v39 = vld [vmem:[%s3879_s6 + $0x280] sm:$0xff]   ;;  %v3294_v41 = vld [vmem:[%s3879_s6 + $0x248] sm:$0xff]  }
 0x25e   :  { %v1411_v52 = vadd.f32 %v1410_v48, %v1148_v2  ;;  %v1462_v53 = vadd.f32 %v1461_v49, %v1199_v3  ;;  %v1412_v54 = vpop.f32.mrb[25].mxu0  ;;  %v1463_v55 = vpop.f32.mrb[25].mxu1  ;;  %v1526_v37 = vrot.slane %v3659_v44, 4  ;;  %v1528_v38 = vrot.slane %v3661_v45, 4  ;;  %v3295_v42 = vld [vmem:[%s3879_s6 + $0x2c8] sm:$0xff]   ;;  %v3300_v48 = vld [vmem:[%s3879_s6 + $0x210] sm:$0xff]  }
 0x25f   :  { %v3669_v56 = vadd.f32 %v1412_v54, %v1150_v4  ;;  %v3671_v57 = vadd.f32 %v1463_v55, %v1201_v5  ;;  %v1414_v58 = vpop.f32.mrb[26].mxu0  ;;  %v1465_v59 = vpop.f32.mrb[26].mxu1  ;;  %2341 = vmatprep.mubr.bf16.mxu0 %v1515_v46  ;;  %2381 = vmatprep.mubr.bf16.mxu1 %v1517_v47  ;;  %v1527_v60 = vrot.slane %v1515_v46, 4  ;;  %v1529_v62 = vrot.slane %v1517_v47, 4  ;;  %v3264_v5 = vld [vmem:[%s3879_s6 + $0x108] sm:$0xff]   ;;  %v3298_v46 = vld [vmem:[%s3879_s6 + $0x250] sm:$0xff]  }
 0x260   :  { %v3679_v1 = vadd.f32 %v1473_v17, %v1411_v52  ;;  %v3681_v2 = vadd.f32 %v1481_v18, %v1462_v53  ;;  %v1415_v3 = vpop.f32.mrb[27].mxu0  ;;  %v1466_v4 = vpop.f32.mrb[27].mxu1  ;;  %2342 = vmatmul.mubr.bf16.vlgmr.msra.gmra.mrb[28].mxu0 %v3659_v44  ;;  %2382 = vmatmul.mubr.bf16.vlgmr.msra.gmra.mrb[28].mxu1 %v3661_v45  ;;  %v3276_v17 = vld [vmem:[%s3879_s6 + $0x120] sm:$0xff]   ;;  %v3296_v44 = vld [vmem:[%s3879_s6 + $0x208] sm:$0xff]   ;;  %v3299_v47 = vld [vmem:[%s3879_s6 + $0x2d0] sm:$0xff]  }
 0x261   :  { %2955 = vmatpush3.bf16.msra.mxu0 %v3260_v50  ;;  %2977 = vmatpush3.bf16.msra.mxu1 %v3261_v51  ;;  %v3277_v18 = vld [vmem:[%s3879_s6 + $0x1a0] sm:$0xff]   ;;  %v1499_v31 = vadd.f32 %v3651_v19, %v3669_v56  ;;  %v1501_v32 = vadd.f32 %v3653_v20, %v3671_v57  ;;  %v3297_v45 = vld [vmem:[%s3879_s6 + $0x288] sm:$0xff]   ;;  %v3301_v49 = vld [vmem:[%s3879_s6 + $0x290] sm:$0xff]  }
 0x262   :  { %2421 = vmatprep.mubr.bf16.mxu0 %v1527_v60  ;;  %2461 = vmatprep.mubr.bf16.mxu1 %v1529_v62  ;;  %v3291_v19 = vld [vmem:[%s3879_s6 + $0x2c0] sm:$0xff]   ;;  %v3302_v50 = vld [vmem:[%s3879_s6 + $0x258] sm:$0xff]   ;;  %v3310_v58 = vld [vmem:[%s3879_s6 + $0x268] sm:$0xff]  }
 0x263   :  { %2956 = vmatprep.subr.bf16.mxu0 %v3262_v63  ;;  %2978 = vmatprep.subr.bf16.mxu1 %v3263_v0  ;;  %v1511_v20 = vmax.f32 %v1499_v31, 0.0  ;;  %v1513_v35 = vmax.f32 %v1501_v32, 0.0  ;;  %v3303_v51 = vld [vmem:[%s3879_s6 + $0x2d8] sm:$0xff]   ;;  %v3306_v54 = vld [vmem:[%s3879_s6 + $0x260] sm:$0xff]   ;;  %v3311_v59 = vld [vmem:[%s3879_s6 + $0x2e8] sm:$0xff]  }
 0x264   :  { %v3304_v52 = vld [vmem:[%s3879_s6 + $0x218] sm:$0xff]   ;;  %v3307_v55 = vld [vmem:[%s3879_s6 + $0x2e0] sm:$0xff]   ;;  %v3312_v60 = vld [vmem:[%s3879_s6 + $0x228] sm:$0xff]  }
 0x265   :  { %2957 = vmatpush3.bf16.msra.mxu0 %v3264_v5  ;;  %2979 = vmatpush3.bf16.msra.mxu1 %v3265_v6  ;;  %v1519_v40 = vpack.c.bf16 %v1511_v20, %v1511_v20  ;;  %v1521_v43 = vpack.c.bf16 %v1513_v35, %v1513_v35  ;;  %v3305_v53 = vld [vmem:[%s3879_s6 + $0x298] sm:$0xff]   ;;  %v3308_v56 = vld [vmem:[%s3879_s6 + $0x220] sm:$0xff]   ;;  %v3313_v62 = vld [vmem:[%s3879_s6 + $0x2a8] sm:$0xff]  }
 0x266   :  { %2958 = vmatprep.subr.bf16.mxu0 %v3266_v7  ;;  %2980 = vmatprep.subr.bf16.mxu1 %v3267_v8  ;;  %v3309_v57 = vld [vmem:[%s3879_s6 + $0x2a0] sm:$0xff]   ;;  %v3314_v63 = vld [vmem:[%s3879_s6 + $0x270] sm:$0xff]   ;;  %v3318_v5 = vld [vmem:[%s3879_s6 + $0x278] sm:$0xff]   ;;  %v1510_v8 = vmax.f32 %v3679_v1, 0.0 }
 0x267   :  { %v3315_v0 = vld [vmem:[%s3879_s6 + $0x2f0] sm:$0xff]   ;;  %v3319_v6 = vld [vmem:[%s3879_s6 + $0x2f8] sm:$0xff]   ;;  %v2701_v1 = vld [vmem:[%s3880_s7] ss:$0 sm:$0xff] }
 0x268   :  { %v3316_v3 = vld [vmem:[%s3879_s6 + $0x230] sm:$0xff]   ;;  %v3320_v7 = vld [vmem:[%s3879_s6 + $0x238] sm:$0xff]  }
 0x269   :  { %2959 = vmatpush3.bf16.msra.mxu0 %v3268_v9  ;;  %2981 = vmatpush3.bf16.msra.mxu1 %v3269_v10  ;;  %v3317_v4 = vld [vmem:[%s3879_s6 + $0x2b0] sm:$0xff]   ;;  %v3321_v9 = vld [vmem:[%s3879_s6 + $0x2b8] sm:$0xff]   ;;  %v1512_v10 = vmax.f32 %v3681_v2, 0.0 }
 0x26a   :  { %2960 = vmatprep.subr.bf16.mxu0 %v3270_v11  ;;  %2982 = vmatprep.subr.bf16.mxu1 %v3271_v12  ;;  %v1518_v11 = vpack.c.bf16 %v1510_v8, %v1510_v8 }
 0x26b   :  { %v1520_v12 = vpack.c.bf16 %v1512_v10, %v1512_v10 }
 0x26d   :  { %2961 = vmatpush3.bf16.msra.mxu0 %v3272_v13  ;;  %2983 = vmatpush3.bf16.msra.mxu1 %v3273_v14 }
 0x26e   :  { %2962 = vmatprep.subr.bf16.mxu0 %v3274_v15  ;;  %2984 = vmatprep.subr.bf16.mxu1 %v3275_v16 }
 0x271   :  { %2963 = vmatpush3.bf16.msra.mxu0 %v3276_v17  ;;  %2985 = vmatpush3.bf16.msra.mxu1 %v3277_v18 }
 0x272   :  { %2964 = vmatprep.subr.bf16.mxu0 %v3278_v21  ;;  %2986 = vmatprep.subr.bf16.mxu1 %v3279_v22 }
 0x275   :  { %2965 = vmatpush3.bf16.msra.mxu0 %v3280_v23  ;;  %2987 = vmatpush3.bf16.msra.mxu1 %v3281_v24 }
 0x276   :  { %2966 = vmatprep.subr.bf16.mxu0 %v3282_v25  ;;  %2988 = vmatprep.subr.bf16.mxu1 %v3283_v26 }
 0x279   :  { %2967 = vmatpush3.bf16.msra.mxu0 %v3284_v27  ;;  %2989 = vmatpush3.bf16.msra.mxu1 %v3285_v28 }
 0x27a   :  { %2968 = vmatprep.subr.bf16.mxu0 %v3286_v29  ;;  %2990 = vmatprep.subr.bf16.mxu1 %v3287_v30 }
 0x27d   :  { %2969 = vmatpush3.bf16.msra.mxu0 %v3288_v33  ;;  %2991 = vmatpush3.bf16.msra.mxu1 %v3289_v34 }
 0x27e   :  { %2998 = vmatprep.subr.bf16.mxu0 %v3290_v61  ;;  %3020 = vmatprep.subr.bf16.mxu1 %v3291_v19 }
 0x280   :  { %2422 = vmatmul.mubr.bf16.vlgmr.msra.gmra.mrb[32].mxu0 %v1526_v37  ;;  %2462 = vmatmul.mubr.bf16.vlgmr.msra.gmra.mrb[32].mxu1 %v1528_v38 }
 0x281   :  { %2999 = vmatpush3.bf16.msra.mxu0 %v3292_v36  ;;  %2501 = vmatprep.mubr.bf16.mxu0 %v1519_v40 }
 0x282   :  { %3021 = vmatpush3.bf16.msra.mxu1 %v3293_v39  ;;  %2541 = vmatprep.mubr.bf16.mxu1 %v1521_v43 }
 0x283   :  { %3000 = vmatprep.subr.bf16.mxu0 %v3294_v41  ;;  %3022 = vmatprep.subr.bf16.mxu1 %v3295_v42 }
 0x285   :  { %3001 = vmatpush3.bf16.msra.mxu0 %v3296_v44 }
 0x286   :  { %3023 = vmatpush3.bf16.msra.mxu1 %v3297_v45  ;;  %3002 = vmatprep.subr.bf16.mxu0 %v3298_v46 }
 0x287   :  { %3024 = vmatprep.subr.bf16.mxu1 %v3299_v47 }
 0x289   :  { %3003 = vmatpush3.bf16.msra.mxu0 %v3300_v48 }
 0x28a   :  { %3025 = vmatpush3.bf16.msra.mxu1 %v3301_v49  ;;  %3004 = vmatprep.subr.bf16.mxu0 %v3302_v50 }
 0x28b   :  { %3026 = vmatprep.subr.bf16.mxu1 %v3303_v51 }
 0x28d   :  { %3005 = vmatpush3.bf16.msra.mxu0 %v3304_v52 }
 0x28e   :  { %3027 = vmatpush3.bf16.msra.mxu1 %v3305_v53  ;;  %3006 = vmatprep.subr.bf16.mxu0 %v3306_v54 }
 0x28f   :  { %3028 = vmatprep.subr.bf16.mxu1 %v3307_v55 }
 0x291   :  { %3007 = vmatpush3.bf16.msra.mxu0 %v3308_v56 }
 0x292   :  { %3029 = vmatpush3.bf16.msra.mxu1 %v3309_v57  ;;  %3008 = vmatprep.subr.bf16.mxu0 %v3310_v58 }
 0x293   :  { %3030 = vmatprep.subr.bf16.mxu1 %v3311_v59 }
 0x295   :  { %3009 = vmatpush3.bf16.msra.mxu0 %v3312_v60 }
 0x296   :  { %3031 = vmatpush3.bf16.msra.mxu1 %v3313_v62  ;;  %3010 = vmatprep.subr.bf16.mxu0 %v3314_v63 }
 0x297   :  { %3032 = vmatprep.subr.bf16.mxu1 %v3315_v0 }
 0x299   :  { %3011 = vmatpush3.bf16.msra.mxu0 %v3316_v3 }
 0x29a   :  { %3033 = vmatpush3.bf16.msra.mxu1 %v3317_v4  ;;  %3012 = vmatprep.subr.bf16.mxu0 %v3318_v5 }
 0x29b   :  { %3034 = vmatprep.subr.bf16.mxu1 %v3319_v6 }
 0x29d   :  { %3013 = vmatpush3.bf16.msra.mxu0 %v3320_v7 }
 0x29e   :  { %3035 = vmatpush3.bf16.msra.mxu1 %v3321_v9 }
 0x2a0   :  { %2502 = vmatmul.mubr.bf16.vlgmr.msra.gmra.mrb[36].mxu0 %v1518_v11 }
 0x2a1   :  { %2542 = vmatmul.mubr.bf16.vlgmr.msra.gmra.mrb[36].mxu1 %v1520_v12 }
 0x333   :  { %v2926_v13 = vpop.f32.mrb[28].mxu0  ;;  %v2948_v14 = vpop.f32.mrb[28].mxu1 }
 0x334   :  { %v2927_v15 = vpop.f32.mrb[29].mxu0  ;;  %v2949_v16 = vpop.f32.mrb[29].mxu1 }
 0x335   :  { %v2928_v17 = vadd.f32 %v2927_v15, %v2926_v13  ;;  %v2950_v18 = vadd.f32 %v2949_v16, %v2948_v14  ;;  %v2929_v21 = vpop.f32.mrb[30].mxu0  ;;  %v2951_v22 = vpop.f32.mrb[30].mxu1 }
 0x336   :  { %v2930_v2 = vpop.f32.mrb[31].mxu0  ;;  %v2952_v23 = vpop.f32.mrb[31].mxu1 }
 0x337   :  { %v2344_v24 = vadd.f32 %v2928_v17, %v2701_v1 }
 0x339   :  { %v2384_v25 = vadd.f32 %v2950_v18, %v2344_v24 }
 0x353   :  { %v2970_v26 = vpop.f32.mrb[32].mxu0  ;;  %v2992_v27 = vpop.f32.mrb[32].mxu1 }
 0x354   :  { %v2971_v28 = vpop.f32.mrb[33].mxu0  ;;  %v2993_v29 = vpop.f32.mrb[33].mxu1 }
 0x355   :  { %v2972_v30 = vadd.f32 %v2971_v28, %v2970_v26  ;;  %v2994_v31 = vadd.f32 %v2993_v29, %v2992_v27  ;;  %v2973_v32 = vpop.f32.mrb[34].mxu0  ;;  %v2995_v33 = vpop.f32.mrb[34].mxu1 }
 0x356   :  { %v2974_v34 = vpop.f32.mrb[35].mxu0  ;;  %v2996_v61 = vpop.f32.mrb[35].mxu1 }
 0x357   :  { %v2424_v19 = vadd.f32 %v2972_v30, %v2384_v25 }
 0x359   :  { %v2464_v20 = vadd.f32 %v2994_v31, %v2424_v19 }
 0x373   :  { %v3014_v35 = vpop.f32.mrb[36].mxu0 }
 0x374   :  { %v3036_v36 = vpop.f32.mrb[36].mxu1  ;;  %v3015_v37 = vpop.f32.mrb[37].mxu0 }
 0x375   :  { %v3016_v38 = vadd.f32 %v3015_v37, %v3014_v35  ;;  %v3037_v39 = vpop.f32.mrb[37].mxu1  ;;  %v3017_v40 = vpop.f32.mrb[38].mxu0 }
 0x376   :  { %v3038_v41 = vadd.f32 %v3037_v39, %v3036_v36  ;;  %v3039_v42 = vpop.f32.mrb[38].mxu1  ;;  %v3018_v43 = vpop.f32.mrb[39].mxu0 }
 0x377   :  { %v2504_v44 = vadd.f32 %v3016_v38, %v2464_v20  ;;  %v3040_v45 = vpop.f32.mrb[39].mxu1 }
 0x379   :  { %v2544_v46 = vadd.f32 %v3038_v41, %v2504_v44 }
 0x37b   :  { %2549 = vst [vmem:[%s3881_s8] sm:$0xff] %v2544_v46 }
 0x37c   :  { %2554 = vsyncpa [#allocation3], 1 }
 0x37d   :  { %2555 = vsyncpa [#allocation5], 1 }

</bundles_post_ra>
